<compile_context>
chip_gen: v7x
topology: tpu7x:2x2x1
jax: 0.10.0
libtpu: 0.0.40
codegen_flags: <defaults>
</compile_context>

<pallas_src>
import jax
import jax.numpy as jnp
from jax import lax
from jax.experimental import pallas as pl
from jax.experimental.pallas import tpu as pltpu

HIDDEN = 16  # latent size of the GMF embeddings (fixed by the PyTorch module)


def _round_up(x, m):
    return ((x + m - 1) // m) * m


def gmf_kernel(mu_ref, mv_ref, wu_ref, bu_ref, wv_ref, bv_ref, wo_ref, bo_ref, out_ref):
    """One batch tile: two embedding matmuls -> GMF interaction -> sigmoid head."""
    # Embedding matmuls, f32 MXU accumulation. Weights are pre-transposed (in_dim, 16).
    u_lat = jnp.dot(mu_ref[...], wu_ref[...], preferred_element_type=jnp.float32) + bu_ref[...]
    v_lat = jnp.dot(mv_ref[...], wv_ref[...], preferred_element_type=jnp.float32) + bv_ref[...]

    # GMF interaction; Identity layer and eval-mode Dropout(0.1) are no-ops.
    # TODO(synk): training-mode dropout would need pltpu.prng_seed/prng_random_bits masking.
    prod = u_lat * v_lat                                   # (tile_b, 16) f32

    # Output head: contract wo (8,16) with prod (tile_b,16) on the last axis -> (8, tile_b).
    # No explicit prod.T (that would be an XLU transpose); the MXU takes the transposed operand.
    head = lax.dot_general(
        wo_ref[...], prod,
        dimension_numbers=(((1,), (1,)), ((), ())),
        preferred_element_type=jnp.float32,
    )
    logits = head[0:1, :] + bo_ref[0]                      # (1, tile_b), row 0 holds wo
    out_ref[0] = jax.nn.sigmoid(logits)                    # lane-dense store into (1,1,tile_b)


def prepare_gmf_params(params):
    """One-time fold of PyTorch-layout params into pre-transposed f32 kernel operands."""
    wu, bu, wv, bv, wo, bo = params
    wu_t = wu.T.astype(jnp.float32)                        # (user_dim, 16)
    wv_t = wv.T.astype(jnp.float32)                        # (item_dim, 16)
    bu_r = bu.reshape(1, HIDDEN).astype(jnp.float32)
    bv_r = bv.reshape(1, HIDDEN).astype(jnp.float32)
    # Output-head weight padded to 8 sublanes (row 0 = wo); scalar bias goes to SMEM.
    wo_head = jnp.zeros((8, HIDDEN), jnp.float32).at[0].set(wo[0].astype(jnp.float32))
    bo_s = bo.reshape((1,)).astype(jnp.float32)
    return wu_t, bu_r, wv_t, bv_r, wo_head, bo_s


def gmf_forward(M_u, M_v, fused_params, *, tile_b=8192):
    """Batch-tiled GMF forward. Inputs are streamed in their native dtype (no pre-pass)."""
    wu_t, bu_r, wv_t, bv_r, wo_head, bo_s = fused_params
    B, user_dim = M_u.shape
    item_dim = M_v.shape[1]

    # Clamp the batch tile for small batches; multiples of 128 keep blocks (8,128)-aligned.
    # On v7x, prefer >= 2 tiles so both TensorCores get work via the "parallel" batch axis.
    tile_b = int(min(_round_up(tile_b, 128), _round_up(B, 128)))
    b_pad = _round_up(B, tile_b)
    num_tiles = b_pad // tile_b

    # Only pad the batch dim (and only when needed). No concat / lane-pad / dtype cast.
    if b_pad != B:
        M_u = jnp.pad(M_u, ((0, b_pad - B), (0, 0)))
        M_v = jnp.pad(M_v, ((0, b_pad - B), (0, 0)))

    grid_spec = pltpu.PrefetchScalarGridSpec(
        num_scalar_prefetch=0,
        grid=(num_tiles,),
        in_specs=[
            pl.BlockSpec((tile_b, user_dim), lambda i: (i, 0)),     # streamed M_u tile
            pl.BlockSpec((tile_b, item_dim), lambda i: (i, 0)),     # streamed M_v tile
            pl.BlockSpec((user_dim, HIDDEN), lambda i: (0, 0)),     # Wu^T, VMEM-resident
            pl.BlockSpec((1, HIDDEN), lambda i: (0, 0)),            # bu,   VMEM-resident
            pl.BlockSpec((item_dim, HIDDEN), lambda i: (0, 0)),     # Wv^T, VMEM-resident
            pl.BlockSpec((1, HIDDEN), lambda i: (0, 0)),            # bv,   VMEM-resident
            pl.BlockSpec((8, HIDDEN), lambda i: (0, 0)),            # wo head, VMEM-resident
            pl.BlockSpec(memory_space=pltpu.MemorySpace.SMEM),      # output bias scalar (SMEM)
        ],
        out_specs=pl.BlockSpec((1, 1, tile_b), lambda i: (i, 0, 0)),
    )

    itemsize = jnp.dtype(M_u.dtype).itemsize
    cost = pl.CostEstimate(
        flops=2 * b_pad * (user_dim + item_dim + 1) * HIDDEN,
        transcendentals=b_pad,                               # sigmoid exp per row
        bytes_accessed=b_pad * (user_dim + item_dim) * itemsize    # input stream
        + b_pad * 4                                          # output
        + (user_dim + item_dim + 2 + 8) * HIDDEN * 4,        # resident weights/biases
    )

    out_slab = pl.pallas_call(
        gmf_kernel,
        out_shape=jax.ShapeDtypeStruct((num_tiles, 1, tile_b), jnp.float32),
        grid_spec=grid_spec,
        compiler_params=pltpu.CompilerParams(
            dimension_semantics=("parallel",),  # shard batch tiles across TCs (v7x megacore)
            vmem_limit_bytes=32 * 1024 * 1024,  # headroom for large tile_b with f32 inputs (v5e)
        ),
        cost_estimate=cost,
    )(M_u, M_v, wu_t, bu_r, wv_t, bv_r, wo_head, bo_s)

    # Lane-dense slab -> (B, 1) column expected by the PyTorch module.
    return out_slab.reshape(b_pad)[:B].reshape(B, 1)


def init_params(key, user_dim, item_dim, hidden=HIDDEN):
    """Deterministic PyTorch-Linear-style init: U(-1/sqrt(fan_in), 1/sqrt(fan_in))."""
    ks = jax.random.split(key, 6)

    def lin(kw, kb, out_f, in_f):
        bound = 1.0 / jnp.sqrt(jnp.float32(in_f))
        w = jax.random.uniform(kw, (out_f, in_f), jnp.float32, -bound, bound)
        b = jax.random.uniform(kb, (1, out_f), jnp.float32, -bound, bound)
        return w, b

    wu, bu = lin(ks[0], ks[1], hidden, user_dim)
    wv, bv = lin(ks[2], ks[3], hidden, item_dim)
    wo, bo = lin(ks[4], ks[5], 1, hidden)
    return wu, bu, wv, bv, wo, bo


if __name__ == "__main__":
    key = jax.random.PRNGKey(0)
    k_mu, k_mv, k_params = jax.random.split(key, 3)

    batch, user_dim, item_dim = 8, 32, 24
    M_u = jax.random.normal(k_mu, (batch, user_dim), jnp.float32)
    M_v = jax.random.normal(k_mv, (batch, item_dim), jnp.float32)

    params = init_params(k_params, user_dim, item_dim)
    fused = prepare_gmf_params(params)

    out = gmf_forward(M_u, M_v, fused)
    out = jax.block_until_ready(out)

    # Plain-JAX f32 reference (dropout in eval mode = identity). Everything is f32 end-to-end
    # now, so the tolerance is tight.
    wu, bu, wv, bv, wo, bo = params
    ref = jax.nn.sigmoid(((M_u @ wu.T + bu) * (M_v @ wv.T + bv)) @ wo.T + bo)
    assert out.shape == (batch, 1)
    assert bool(jnp.all(jnp.isfinite(out)))
    assert jnp.allclose(out, ref, atol=1e-5, rtol=1e-5), float(jnp.max(jnp.abs(out - ref)))

    print("KERNEL_OK")
</pallas_src>

<mosaic_0001>
module attributes {stable_mosaic.version = 11 : i64} {
  func.func @gmf_kernel(%arg0: i32, %arg1: memref<128x32xf32, #tpu.memory_space<vmem>>, %arg2: memref<128x24xf32, #tpu.memory_space<vmem>>, %arg3: memref<32x16xf32, #tpu.memory_space<vmem>>, %arg4: memref<1x16xf32, #tpu.memory_space<vmem>>, %arg5: memref<24x16xf32, #tpu.memory_space<vmem>>, %arg6: memref<1x16xf32, #tpu.memory_space<vmem>>, %arg7: memref<8x16xf32, #tpu.memory_space<vmem>>, %arg8: memref<1xf32, #tpu.memory_space<smem>>, %arg9: memref<1x1x128xf32, #tpu.memory_space<vmem>>) attributes {dimension_semantics = [#tpu.dimension_semantics<parallel>], iteration_bounds = array<i64: 1>, scalar_prefetch = 0 : i64, scratch_operands = 0 : i64, tpu.core_type = #tpu.core_type<tc>, window_params = [{transform_indices = @transform_0, window_bounds = array<i64: 128, 32>}, {transform_indices = @transform_1, window_bounds = array<i64: 128, 24>}, {pipeline_mode = #tpu.pipeline_mode<synchronous>, transform_indices = @transform_2, window_bounds = array<i64: 32, 16>}, {pipeline_mode = #tpu.pipeline_mode<synchronous>, transform_indices = @transform_3, window_bounds = array<i64: 1, 16>}, {pipeline_mode = #tpu.pipeline_mode<synchronous>, transform_indices = @transform_4, window_bounds = array<i64: 24, 16>}, {pipeline_mode = #tpu.pipeline_mode<synchronous>, transform_indices = @transform_5, window_bounds = array<i64: 1, 16>}, {pipeline_mode = #tpu.pipeline_mode<synchronous>, transform_indices = @transform_6, window_bounds = array<i64: 8, 16>}, {transform_indices = @transform_7, window_bounds = array<i64: 1>}, {transform_indices = @transform_8, window_bounds = array<i64: 1, 1, 128>}]} {
    %c0 = arith.constant 0 : index
    %c0_0 = arith.constant 0 : index
    %0 = vector.load %arg1[%c0, %c0_0] : memref<128x32xf32, #tpu.memory_space<vmem>>, vector<128x32xf32>
    %c0_1 = arith.constant 0 : index
    %c0_2 = arith.constant 0 : index
    %1 = vector.load %arg3[%c0_1, %c0_2] : memref<32x16xf32, #tpu.memory_space<vmem>>, vector<32x16xf32>
    %cst = arith.constant dense<0.000000e+00> : vector<128x16xf32>
    %2 = tpu.matmul %0, %1, %cst {dimension_numbers = #tpu.dot_dimension_numbers<[1], [0], [0], [1], [0, 0, 1, 1], [], []>} : vector<128x32xf32>, vector<32x16xf32>, vector<128x16xf32> -> vector<128x16xf32>
    %c0_3 = arith.constant 0 : index
    %c0_4 = arith.constant 0 : index
    %3 = vector.load %arg4[%c0_3, %c0_4] : memref<1x16xf32, #tpu.memory_space<vmem>>, vector<1x16xf32>
    %4 = vector.broadcast %3 : vector<1x16xf32> to vector<128x16xf32>
    %5 = arith.addf %2, %4 : vector<128x16xf32>
    %c0_5 = arith.constant 0 : index
    %c0_6 = arith.constant 0 : index
    %6 = vector.load %arg2[%c0_5, %c0_6] : memref<128x24xf32, #tpu.memory_space<vmem>>, vector<128x24xf32>
    %c0_7 = arith.constant 0 : index
    %c0_8 = arith.constant 0 : index
    %7 = vector.load %arg5[%c0_7, %c0_8] : memref<24x16xf32, #tpu.memory_space<vmem>>, vector<24x16xf32>
    %cst_9 = arith.constant dense<0.000000e+00> : vector<128x16xf32>
    %8 = tpu.matmul %6, %7, %cst_9 {dimension_numbers = #tpu.dot_dimension_numbers<[1], [0], [0], [1], [0, 0, 1, 1], [], []>} : vector<128x24xf32>, vector<24x16xf32>, vector<128x16xf32> -> vector<128x16xf32>
    %c0_10 = arith.constant 0 : index
    %c0_11 = arith.constant 0 : index
    %9 = vector.load %arg6[%c0_10, %c0_11] : memref<1x16xf32, #tpu.memory_space<vmem>>, vector<1x16xf32>
    %10 = vector.broadcast %9 : vector<1x16xf32> to vector<128x16xf32>
    %11 = arith.addf %8, %10 : vector<128x16xf32>
    %12 = arith.mulf %5, %11 : vector<128x16xf32>
    %c0_12 = arith.constant 0 : index
    %c0_13 = arith.constant 0 : index
    %13 = vector.load %arg7[%c0_12, %c0_13] : memref<8x16xf32, #tpu.memory_space<vmem>>, vector<8x16xf32>
    %cst_14 = arith.constant dense<0.000000e+00> : vector<8x128xf32>
    %14 = tpu.matmul %13, %12, %cst_14 {dimension_numbers = #tpu.dot_dimension_numbers<[1], [1], [0], [0], [0, 0, 1, 0], [], []>} : vector<8x16xf32>, vector<128x16xf32>, vector<8x128xf32> -> vector<8x128xf32>
    %15 = vector.extract_strided_slice %14 {offsets = [0, 0], sizes = [1, 128], strides = [1, 1]} : vector<8x128xf32> to vector<1x128xf32>
    %c0_15 = arith.constant 0 : index
    %16 = memref.load %arg8[%c0_15] : memref<1xf32, #tpu.memory_space<smem>>
    %17 = vector.broadcast %16 : f32 to vector<1x128xf32>
    %18 = arith.addf %15, %17 : vector<1x128xf32>
    %19 = arith.negf %18 : vector<1x128xf32>
    %20 = math.exp %19 : vector<1x128xf32>
    %cst_16 = arith.constant 1.000000e+00 : f32
    %21 = vector.broadcast %cst_16 : f32 to vector<1x128xf32>
    %22 = arith.addf %21, %20 : vector<1x128xf32>
    %23 = arith.divf %21, %22 : vector<1x128xf32>
    %c0_17 = arith.constant 0 : index
    %c0_18 = arith.constant 0 : index
    %c0_19 = arith.constant 0 : index
    %24 = vector.load %arg9[%c0_17, %c0_18, %c0_19] : memref<1x1x128xf32, #tpu.memory_space<vmem>>, vector<1x1x128xf32>
    %25 = vector.shape_cast %24 : vector<1x1x128xf32> to vector<1x128xf32>
    %26 = vector.shape_cast %23 : vector<1x128xf32> to vector<1x1x128xf32>
    tpu.vector_store %arg9[%c0_17, %c0_18, %c0_19], %26 {strides = array<i32>} : memref<1x1x128xf32, #tpu.memory_space<vmem>>, vector<1x1x128xf32>,
    return
  }
  func.func @transform_0(%arg0: i32) -> (i32, i32) {
    %c0_i32 = arith.constant 0 : i32
    %c0_i32_0 = arith.constant 0 : i32
    return %arg0, %c0_i32 : i32, i32
  }
  func.func @transform_1(%arg0: i32) -> (i32, i32) {
    %c0_i32 = arith.constant 0 : i32
    %c0_i32_0 = arith.constant 0 : i32
    return %arg0, %c0_i32 : i32, i32
  }
  func.func @transform_2(%arg0: i32) -> (i32, i32) {
    %c0_i32 = arith.constant 0 : i32
    %c0_i32_0 = arith.constant 0 : i32
    %c0_i32_1 = arith.constant 0 : i32
    return %c0_i32, %c0_i32_0 : i32, i32
  }
  func.func @transform_3(%arg0: i32) -> (i32, i32) {
    %c0_i32 = arith.constant 0 : i32
    %c0_i32_0 = arith.constant 0 : i32
    %c0_i32_1 = arith.constant 0 : i32
    return %c0_i32, %c0_i32_0 : i32, i32
  }
  func.func @transform_4(%arg0: i32) -> (i32, i32) {
    %c0_i32 = arith.constant 0 : i32
    %c0_i32_0 = arith.constant 0 : i32
    %c0_i32_1 = arith.constant 0 : i32
    return %c0_i32, %c0_i32_0 : i32, i32
  }
  func.func @transform_5(%arg0: i32) -> (i32, i32) {
    %c0_i32 = arith.constant 0 : i32
    %c0_i32_0 = arith.constant 0 : i32
    %c0_i32_1 = arith.constant 0 : i32
    return %c0_i32, %c0_i32_0 : i32, i32
  }
  func.func @transform_6(%arg0: i32) -> (i32, i32) {
    %c0_i32 = arith.constant 0 : i32
    %c0_i32_0 = arith.constant 0 : i32
    %c0_i32_1 = arith.constant 0 : i32
    return %c0_i32, %c0_i32_0 : i32, i32
  }
  func.func @transform_7(%arg0: i32) -> i32 {
    %c0_i32 = arith.constant 0 : i32
    %c0_i32_0 = arith.constant 0 : i32
    return %c0_i32 : i32
  }
  func.func @transform_8(%arg0: i32) -> (i32, i32, i32) {
    %c0_i32 = arith.constant 0 : i32
    %c0_i32_0 = arith.constant 0 : i32
    %c0_i32_1 = arith.constant 0 : i32
    return %arg0, %c0_i32, %c0_i32_0 : i32, i32, i32
  }
}

</mosaic_0001>

<bundles_post_ra>
// kernel: tpu_custom_call.1
= control target key start
LH: loop header
LB: loop body
LE: loop exit
PB: predicated region body
PF: predicated region fallthrough
CT: control target
= control target key end

     0   :  { %vm58_vm0 = vcmask 261120   ;;  %s1217_s0 = inlined_call_operand.vmem [shape: f32[128,32], index: 0, kind: input, shape index: {}]   ;;  %s1218_s1 = inlined_call_operand.vmem [shape: f32[128,24], index: 1, kind: input, shape index: {}]   ;;  %s1219_s2 = inlined_call_operand.vmem [shape: f32[32,16], index: 2, kind: input, shape index: {}]   ;;  %s1220_s3 = inlined_call_operand.vmem [shape: f32[1,16], index: 3, kind: input, shape index: {}]   ;;  %s1221_s4 = inlined_call_operand.vmem [shape: f32[24,16], index: 4, kind: input, shape index: {}]   ;;  %s1222_s5 = inlined_call_operand.vmem [shape: f32[1,16], index: 5, kind: input, shape index: {}]   ;;  %s1223_s6 = inlined_call_operand.vmem [shape: f32[8,16], index: 6, kind: input, shape index: {}]   ;;  %s1224_s7 = inlined_call_operand.<no memory space> [shape: f32[1], index: 7, kind: input, shape index: {}]   ;;  %s1225_s8 = inlined_call_operand.hbm [shape: f32[1,1,128], index: 8, kind: output, shape index: {}]  }
   0x1   :  { %v47_v0 = vld [vmem:[%s1219_s2] sm:$0xff]  ;;  %v48_v1 = vld [vmem:[%s1219_s2 + $0x8] sm:$0xff]  ;;  %v49_v2 = vld [vmem:[%s1219_s2 + $0x10] sm:$0xff] }
   0x2   :  { %v840_v3 = vpack.c.bf16 %v48_v1, %v47_v0  ;;  %v50_v4 = vld [vmem:[%s1219_s2 + $0x18] sm:$0xff]  ;;  %v31_v5 = vld [vmem:[%s1217_s0] sm:$0xff]  ;;  %v269_v8 = vld [vmem:[%s1221_s4 + $0x8] sm:$0xff] }
   0x3   :  { %v844_v6 = vpack.c.bf16 %v50_v4, %v49_v2  ;;  %751 = vmatprep.mubr.msk.f32.mxu0 %vm58_vm0, %v31_v5  ;;  %v268_v7 = vld [vmem:[%s1221_s4] sm:$0xff]  ;;  %v32_v10 = vld [vmem:[%s1217_s0 + $0x8] sm:$0xff]  ;;  %v33_v11 = vld [vmem:[%s1217_s0 + $0x10] sm:$0xff] }
   0x4   :  { %841 = vmatprep.subr.bf16.mxu0 %v840_v3  ;;  %v848_v9 = vpack.c.bf16 %v269_v8, %v268_v7  ;;  %v270_v12 = vld [vmem:[%s1221_s4 + $0x10] sm:$0xff]  ;;  %v34_v13 = vld [vmem:[%s1217_s0 + $0x18] sm:$0xff]  ;;  %v35_v14 = vld [vmem:[%s1217_s0 + $0x20] sm:$0xff] }
   0x5   :  { %843 = vmatpush3.bf16.msra.mxu0 %v840_v3 }
   0x6   :  { %845 = vmatprep.subr.bf16.mxu0 %v844_v6 }
   0x9   :  { %847 = vmatpush3.bf16.msra.mxu0 %v844_v6 }
   0xa   :  { %849 = vmatprep.subr.bf16.mxu0 %v848_v9 }
   0xc   :  { %752 = vmatmul.mubr.msk.f32.vlgmr.msra.gmra.mrb[0].mxu0 %vm58_vm0, %v32_v10 }
   0xd   :  { %851 = vmatpush3.bf16.msra.mxu0 %v848_v9  ;;  %754 = vmatprep.mubr.msk.f32.mxu0 %vm58_vm0, %v33_v11 }
   0xe   :  { %779 = vmatprep.subr.mxu0 %v270_v12 }
   0xf   :  { %14 = vsyncpa [#allocation4], 0  ;;  %v36_v15 = vld [vmem:[%s1217_s0 + $0x28] sm:$0xff]  ;;  %v37_v16 = vld [vmem:[%s1217_s0 + $0x30] sm:$0xff]  ;;  %vm278_vm1 = vcmask 195584   ;;  %v916_v42 = vmov 0.0|0.0  }
  0x10   :  { %755 = vmatmul.mubr.msk.f32.gmra.mrb[2].mxu0 %vm58_vm0, %v34_v13  ;;  %v38_v17 = vld [vmem:[%s1217_s0 + $0x38] sm:$0xff]  ;;  %v39_v18 = vld [vmem:[%s1217_s0 + $0x40] sm:$0xff]  ;;  %v40_v19 = vld [vmem:[%s1217_s0 + $0x48] sm:$0xff]  ;;  %852 = vmatprep.subr.bf16.mxu1 %v916_v42  ;;  %vm917_vm2 = vmmov 0   ;;  %v918_v43 = vmov 0.0   ;;  %vm489_vm3 = vcmask 130048  }
  0x11   :  { %757 = vmatprep.mubr.msk.f32.mxu0 %vm58_vm0, %v35_v14  ;;  %780 = vmatpush3.msra.mxu0 %v270_v12  ;;  %v41_v20 = vld [vmem:[%s1217_s0 + $0x50] sm:$0xff]  ;;  %v42_v21 = vld [vmem:[%s1217_s0 + $0x58] sm:$0xff]  ;;  %v43_v22 = vld [vmem:[%s1217_s0 + $0x60] sm:$0xff]  ;;  %s919_s14 = smov [#allocation3]  }
  0x12   :  { %v44_v23 = vld [vmem:[%s1217_s0 + $0x68] sm:$0xff]  ;;  %v45_v24 = vld [vmem:[%s1217_s0 + $0x70] sm:$0xff]  ;;  %v46_v25 = vld [vmem:[%s1217_s0 + $0x78] sm:$0xff]  ;;  %837 = vmatprep.mubr.msk.f32.mxu1 %vm917_vm2, %v918_v43  ;;  %s627_s15 = sshll.u32 %s919_s14, 4  ;;  %s628_s15 = int_to_ptr.vmem [resolvable:$true] %s627_s15 }
  0x13   :  { %v252_v26 = vld [vmem:[%s1218_s1] sm:$0xff]  ;;  %v253_v27 = vld [vmem:[%s1218_s1 + $0x8] sm:$0xff]  ;;  %v254_v28 = vld [vmem:[%s1218_s1 + $0x10] sm:$0xff]  ;;  %s896_s16 = scalar_lea.vmem %s628_s15, 32  ;;  %p897_p1 = scmp.lt.s32.totalorder %s628_s15, %s628_s15 }
  0x14   :  { %758 = vmatmul.mubr.msk.f32.gmra.mrb[4].mxu0 %vm58_vm0, %v36_v15  ;;  %v255_v29 = vld [vmem:[%s1218_s1 + $0x18] sm:$0xff]  ;;  %v256_v30 = vld [vmem:[%s1218_s1 + $0x20] sm:$0xff]  ;;  %v257_v31 = vld [vmem:[%s1218_s1 + $0x28] sm:$0xff] }
  0x15   :  { %760 = vmatprep.mubr.msk.f32.mxu0 %vm58_vm0, %v37_v16  ;;  %v258_v32 = vld [vmem:[%s1218_s1 + $0x30] sm:$0xff]  ;;  %v259_v33 = vld [vmem:[%s1218_s1 + $0x38] sm:$0xff]  ;;  %v260_v34 = vld [vmem:[%s1218_s1 + $0x40] sm:$0xff] }
  0x16   :  { %v261_v35 = vld [vmem:[%s1218_s1 + $0x48] sm:$0xff]  ;;  %v262_v36 = vld [vmem:[%s1218_s1 + $0x50] sm:$0xff]  ;;  %v263_v37 = vld [vmem:[%s1218_s1 + $0x58] sm:$0xff] }
  0x17   :  { %v264_v38 = vld [vmem:[%s1218_s1 + $0x60] sm:$0xff]  ;;  %v265_v39 = vld [vmem:[%s1218_s1 + $0x68] sm:$0xff]  ;;  %v266_v40 = vld [vmem:[%s1218_s1 + $0x70] sm:$0xff] }
  0x18   :  { %761 = vmatmul.mubr.msk.f32.gmra.mrb[6].mxu0 %vm58_vm0, %v38_v17  ;;  %v267_v41 = vld [vmem:[%s1218_s1 + $0x78] sm:$0xff]  ;;  %v1126_v60 = vld [vmem:[%s1220_s3] ss:$0 sm:$0xff]  ;;  %vm1141_vm4 = vmpackc.low %vm489_vm3, %vm489_vm3 }
  0x19   :  { %763 = vmatprep.mubr.msk.f32.mxu0 %vm58_vm0, %v39_v18  ;;  %v1131_v61 = vld [vmem:[%s1222_s5] ss:$0 sm:$0xff] }
  0x1c   :  { %764 = vmatmul.mubr.msk.f32.gmra.mrb[8].mxu0 %vm58_vm0, %v40_v19 }
  0x1d   :  { %766 = vmatprep.mubr.msk.f32.mxu0 %vm58_vm0, %v41_v20 }
  0x20   :  { %767 = vmatmul.mubr.msk.f32.gmra.mrb[10].mxu0 %vm58_vm0, %v42_v21 }
  0x21   :  { %769 = vmatprep.mubr.msk.f32.mxu0 %vm58_vm0, %v43_v22 }
  0x24   :  { %770 = vmatmul.mubr.msk.f32.gmra.mrb[12].mxu0 %vm58_vm0, %v44_v23 }
  0x25   :  { %772 = vmatprep.mubr.msk.f32.mxu0 %vm58_vm0, %v45_v24 }
  0x28   :  { %773 = vmatmul.mubr.msk.f32.gmra.mrb[14].mxu0 %vm58_vm0, %v46_v25 }
  0x29   :  { %781 = vmatprep.mubr.msk.f32.mxu0 %vm278_vm1, %v252_v26 }
  0x2c   :  { %782 = vmatmul.mubr.msk.f32.vlgmr.msra.gmra.mrb[16].mxu0 %vm278_vm1, %v253_v27 }
  0x2d   :  { %784 = vmatprep.mubr.msk.f32.mxu0 %vm278_vm1, %v254_v28 }
  0x30   :  { %785 = vmatmul.mubr.msk.f32.gmra.mrb[18].mxu0 %vm278_vm1, %v255_v29 }
  0x31   :  { %787 = vmatprep.mubr.msk.f32.mxu0 %vm278_vm1, %v256_v30 }
  0x34   :  { %788 = vmatmul.mubr.msk.f32.gmra.mrb[20].mxu0 %vm278_vm1, %v257_v31 }
  0x35   :  { %790 = vmatprep.mubr.msk.f32.mxu0 %vm278_vm1, %v258_v32 }
  0x38   :  { %791 = vmatmul.mubr.msk.f32.gmra.mrb[22].mxu0 %vm278_vm1, %v259_v33 }
  0x39   :  { %793 = vmatprep.mubr.msk.f32.mxu0 %vm278_vm1, %v260_v34 }
  0x3c   :  { %794 = vmatmul.mubr.msk.f32.gmra.mrb[24].mxu0 %vm278_vm1, %v261_v35 }
  0x3d   :  { %796 = vmatprep.mubr.msk.f32.mxu0 %vm278_vm1, %v262_v36 }
  0x40   :  { %797 = vmatmul.mubr.msk.f32.gmra.mrb[26].mxu0 %vm278_vm1, %v263_v37 }
  0x41   :  { %799 = vmatprep.mubr.msk.f32.mxu0 %vm278_vm1, %v264_v38 }
  0x44   :  { %800 = vmatmul.mubr.msk.f32.gmra.mrb[28].mxu0 %vm278_vm1, %v265_v39 }
  0x45   :  { %802 = vmatprep.mubr.msk.f32.mxu0 %vm278_vm1, %v266_v40 }
  0x48   :  { %803 = vmatmul.mubr.msk.f32.gmra.mrb[30].mxu0 %vm278_vm1, %v267_v41 }
  0xdf   :  { %v753_v44 = vpop.f32.mrb[0].mxu0 }
  0xe0   :  { %v173_v45 = vpop.f32.mrb[1].mxu0  ;;  %v179_v63 = vadd.f32 %v753_v44, %v1126_v60 }
  0xe1   :  { %v174_v2 = vadd.f32 %v1126_v60, %v173_v45 }
  0xe3   :  { %v756_v46 = vpop.f32.mrb[2].mxu0 }
  0xe4   :  { %v183_v47 = vpop.f32.mrb[3].mxu0  ;;  %v189_v7 = vadd.f32 %v756_v46, %v1126_v60 }
  0xe5   :  { %v184_v11 = vadd.f32 %v1126_v60, %v183_v47 }
  0xe7   :  { %v759_v48 = vpop.f32.mrb[4].mxu0 }
  0xe8   :  { %v193_v49 = vpop.f32.mrb[5].mxu0  ;;  %v199_v17 = vadd.f32 %v759_v48, %v1126_v60 }
  0xe9   :  { %v194_v20 = vadd.f32 %v1126_v60, %v193_v49 }
  0xeb   :  { %v762_v50 = vpop.f32.mrb[6].mxu0 }
  0xec   :  { %v203_v51 = vpop.f32.mrb[7].mxu0  ;;  %v209_v26 = vadd.f32 %v762_v50, %v1126_v60 }
  0xed   :  { %v204_v29 = vadd.f32 %v1126_v60, %v203_v51 }
  0xef   :  { %v765_v52 = vpop.f32.mrb[8].mxu0 }
  0xf0   :  { %v213_v53 = vpop.f32.mrb[9].mxu0  ;;  %v219_v35 = vadd.f32 %v765_v52, %v1126_v60 }
  0xf1   :  { %v214_v38 = vadd.f32 %v1126_v60, %v213_v53 }
  0xf3   :  { %v768_v54 = vpop.f32.mrb[10].mxu0 }
  0xf4   :  { %v223_v55 = vpop.f32.mrb[11].mxu0  ;;  %v229_v45 = vadd.f32 %v768_v54, %v1126_v60 }
  0xf5   :  { %v224_v48 = vadd.f32 %v1126_v60, %v223_v55 }
  0xf7   :  { %v1115_v56 = vpop.f32.mrb[12].mxu0 }
  0xf8   :  { %v1117_v57 = vpop.f32.mrb[13].mxu0  ;;  %v239_v53 = vadd.f32 %v1115_v56, %v1126_v60 }
  0xf9   :  { %v234_v55 = vadd.f32 %v1126_v60, %v1117_v57 }
  0xfb   :  { %v1119_v58 = vpop.f32.mrb[14].mxu0 }
  0xfc   :  { %v1121_v59 = vpop.f32.mrb[15].mxu0 }
  0xff   :  { %v783_v62 = vpop.f32.mrb[16].mxu0 }
 0x100   :  { %v399_v0 = vadd.f32 %v783_v62, %v1131_v61  ;;  %v393_v1 = vpop.f32.mrb[17].mxu0 }
 0x101   :  { %v394_v3 = vadd.f32 %v1131_v61, %v393_v1 }
 0x102   :  { %v473_v4 = vmul.f32 %v399_v0, %v179_v63 }
 0x103   :  { %v472_v5 = vmul.f32 %v394_v3, %v174_v2  ;;  %v786_v6 = vpop.f32.mrb[18].mxu0 }
 0x104   :  { %v409_v8 = vadd.f32 %v786_v6, %v1131_v61  ;;  %v403_v9 = vpop.f32.mrb[19].mxu0 }
 0x105   :  { %v404_v12 = vadd.f32 %v1131_v61, %v403_v9  ;;  %v853_v13 = vpack.c.bf16 %v473_v4, %v472_v5  ;;  %v249_v5 = vadd.f32 %v1119_v58, %v1126_v60  ;;  %v488_v58 = vld [vmem:[%s1223_s6] sm:$0xff]  ;;  %s892_s6 = scalar_lea.vmem %s628_s15, 16 }
 0x106   :  { %v475_v14 = vmul.f32 %v409_v8, %v189_v7  ;;  %v244_v7 = vadd.f32 %v1126_v60, %v1121_v59  ;;  %v612_v59 = vstv %s1224_s7  ;;  %p893_p0 = scmp.ne.s32.totalorder %s628_s15, %s892_s6  ;;  %p898_p2 = scmp.lt.s32.totalorder %s896_s16, %s892_s6 }
 0x107   :  { %v474_v15 = vmul.f32 %v404_v12, %v184_v11  ;;  %v789_v16 = vpop.f32.mrb[20].mxu0  ;;  %855 = vmatpush3.bf16.xpose.msk.msra.mxu1 %vm1141_vm4, %v853_v13 }
 0x108   :  { %v419_v18 = vadd.f32 %v789_v16, %v1131_v61  ;;  %v413_v19 = vpop.f32.mrb[21].mxu0  ;;  %856 = vmatprep.subr.bf16.mxu1 %v916_v42  ;;  %p899_p3 = por %p898_p2, %p897_p1 }
 0x109   :  { %v857_v21 = vpack.c.bf16 %v475_v14, %v474_v15  ;;  %v414_v22 = vadd.f32 %v1131_v61, %v413_v19 }
 0x10a   :  { %v477_v23 = vmul.f32 %v419_v18, %v199_v17  ;;  %p900_p4 = pnand %p899_p3, %p893_p0 }
 0x10b   :  { %v476_v24 = vmul.f32 %v414_v22, %v194_v20  ;;  %v792_v25 = vpop.f32.mrb[22].mxu0 }
 0x10c   :  { %v429_v27 = vadd.f32 %v792_v25, %v1131_v61  ;;  %v423_v28 = vpop.f32.mrb[23].mxu0 }
 0x10d   :  { %v861_v30 = vpack.c.bf16 %v477_v23, %v476_v24  ;;  %v424_v31 = vadd.f32 %v1131_v61, %v423_v28 }
 0x10e   :  { %v479_v32 = vmul.f32 %v429_v27, %v209_v26 }
 0x10f   :  { %v478_v33 = vmul.f32 %v424_v31, %v204_v29  ;;  %v795_v34 = vpop.f32.mrb[24].mxu0  ;;  %859 = vmatpush3.bf16.xpose.msk.msra.mxu1 %vm1141_vm4, %v857_v21 }
 0x110   :  { %v439_v36 = vadd.f32 %v795_v34, %v1131_v61  ;;  %v433_v37 = vpop.f32.mrb[25].mxu0  ;;  %860 = vmatprep.subr.bf16.mxu1 %v916_v42 }
 0x111   :  { %v865_v39 = vpack.c.bf16 %v479_v32, %v478_v33  ;;  %v434_v40 = vadd.f32 %v1131_v61, %v433_v37 }
 0x112   :  { %v481_v41 = vmul.f32 %v439_v36, %v219_v35 }
 0x113   :  { %v480_v43 = vmul.f32 %v434_v40, %v214_v38  ;;  %v798_v44 = vpop.f32.mrb[26].mxu0 }
 0x114   :  { %v449_v46 = vadd.f32 %v798_v44, %v1131_v61  ;;  %v443_v47 = vpop.f32.mrb[27].mxu0 }
 0x115   :  { %v869_v49 = vpack.c.bf16 %v481_v41, %v480_v43  ;;  %v444_v50 = vadd.f32 %v1131_v61, %v443_v47 }
 0x116   :  { %v483_v51 = vmul.f32 %v449_v46, %v229_v45 }
 0x117   :  { %v482_v52 = vmul.f32 %v444_v50, %v224_v48  ;;  %v801_v62 = vpop.f32.mrb[28].mxu0  ;;  %863 = vmatpush3.bf16.xpose.msk.msra.mxu1 %vm1141_vm4, %v861_v30 }
 0x118   :  { %v459_v63 = vadd.f32 %v801_v62, %v1131_v61  ;;  %v453_v54 = vpop.f32.mrb[29].mxu0  ;;  %864 = vmatprep.subr.bf16.mxu1 %v916_v42 }
 0x119   :  { %v873_v0 = vpack.c.bf16 %v483_v51, %v482_v52  ;;  %v454_v1 = vadd.f32 %v1131_v61, %v453_v54 }
 0x11a   :  { %v485_v2 = vmul.f32 %v459_v63, %v239_v53 }
 0x11b   :  { %v484_v3 = vmul.f32 %v454_v1, %v234_v55  ;;  %v804_v4 = vpop.f32.mrb[30].mxu0 }
 0x11c   :  { %v469_v6 = vadd.f32 %v804_v4, %v1131_v61  ;;  %v463_v56 = vpop.f32.mrb[31].mxu0 }
 0x11d   :  { %v877_v8 = vpack.c.bf16 %v485_v2, %v484_v3  ;;  %v464_v9 = vadd.f32 %v1131_v61, %v463_v56 }
 0x11e   :  { %v487_v11 = vmul.f32 %v469_v6, %v249_v5 }
 0x11f   :  { %v486_v57 = vmul.f32 %v464_v9, %v244_v7  ;;  %867 = vmatpush3.bf16.xpose.msk.msra.mxu1 %vm1141_vm4, %v865_v39 }
 0x120   :  { %868 = vmatprep.subr.bf16.mxu1 %v916_v42 }
 0x121   :  { %v881_v12 = vpack.c.bf16 %v487_v11, %v486_v57 }
 0x127   :  { %871 = vmatpush3.bf16.xpose.msk.msra.mxu1 %vm1141_vm4, %v869_v49 }
 0x128   :  { %872 = vmatprep.subr.bf16.mxu1 %v916_v42 }
 0x12f   :  { %875 = vmatpush3.bf16.xpose.msk.msra.mxu1 %vm1141_vm4, %v873_v0 }
 0x130   :  { %876 = vmatprep.subr.bf16.mxu1 %v916_v42 }
 0x137   :  { %879 = vmatpush3.bf16.xpose.msk.msra.mxu1 %vm1141_vm4, %v877_v8 }
 0x138   :  { %880 = vmatprep.subr.bf16.mxu1 %v916_v42 }
 0x13f   :  { %883 = vmatpush3.bf16.xpose.msk.msra.mxu1 %vm1141_vm4, %v881_v12 }
 0x146   :  { %838 = vmatmul.mubr.msk.f32.vlgmr.msra.gmra.mrb[0].mxu1 %vm489_vm3, %v488_v58 }
 0x219   :  { %v607_v60 = vpop.f32.mrb[0].mxu1 }
 0x21a   :  { %v613_v61 = vadd.f32 %v612_v59, %v607_v60  ;;  %v839_v13 = vpop.f32.mrb[1].mxu1 }
 0x21c   :  { %v686_v14 = vmul.f32 -1.442695, %v613_v61 }
 0x21e   :  { %888 = vpow2.f32 %v686_v14 }
 0x228   :  { %v889_v15 = vpop.eup %888 }
 0x229   :  { %v617_v42 = vadd.f32 1.0, %v889_v15 }
 0x22b   :  { %890 = vrcp.f32 %v617_v42 }
 0x235   :  { %v891_v10 = vpop.eup %890 }
 0x236   :  { %620 = vst [vmem:[#allocation3] sm:$0x1] %v891_v10 }
 0x237   :  { %903 = shalt.err (!%p900_p4)
}
 0x238   :  { %s904_s18 = scalar_lea.hbm %s1225_s8, 16 }
 0x239   :  { %p905_p5 = scmp.ne.s32.totalorder %s1225_s8, %s904_s18  ;;  %p908_p6 = scmp.lt.u32.totalorder %s904_s18, %s1225_s8 }
 0x23b   :  { %p910_p7 = pnand %p908_p6, %p905_p5 }
 0x23d   :  { %913 = shalt.err (!%p910_p7)
}
 0x23e   :  { %630 = dma.vmem_to_hbm [thread:$0]  %s628_s15, 16, %s1225_s8, [#allocation4]  }
 0x23f   :  { %914 = dma.done.wait [#allocation4], 16  }
 0x240   :  { %915 = vsyncadd [#allocation4], 4294967280 }
 0x241   :  { %634 = vsyncpa [#allocation4], 1 }

</bundles_post_ra>
